<compile_context>
chip_gen: v7x
topology: tpu7x:2x2x1
jax: 0.10.0
libtpu: 0.0.40
codegen_flags: <defaults>
</compile_context>

<pallas_src>
import functools

import jax
import jax.numpy as jnp
from jax.experimental import pallas as pl
from jax.experimental.pallas import tpu as pltpu


def _round_up(x: int, m: int) -> int:
    return ((x + m - 1) // m) * m


def _tiles_for(n: int):
    """Returns (TM row-tile, TK reduction-tile, padded N); N_pad % TM == N_pad % TK == 0."""
    if n <= 128:
        return 128, 128, 128
    if n <= 256:
        return 256, 256, 256
    # Mid-size tiles: comfortably inside v7x's 64 MiB VMEM with 2x buffering,
    # while still amortizing the ~0.35us/step grid overhead on v5e/v6e.
    return 256, 512, _round_up(n, 512)


# ---------------------------------------------------------------------------
# Tiled aggregation kernel:  out = [relu](Â @ Z + b)
# ---------------------------------------------------------------------------
def _aggregate_kernel(adj_ref, z_ref, b_ref, out_ref, acc_ref, *, apply_relu):
    k = pl.program_id(1)

    @pl.when(k == 0)
    def _():
        acc_ref[...] = jnp.zeros_like(acc_ref)

    # bf16 × bf16 -> f32 accumulation on the MXU.
    acc_ref[...] += jnp.dot(adj_ref[...], z_ref[...],
                            preferred_element_type=jnp.float32)

    # Epilogue (bias + optional ReLU + store) only on the last reduction step.
    @pl.when(k == pl.num_programs(1) - 1)
    def _():
        r = acc_ref[...] + b_ref[...]
        if apply_relu:
            r = jnp.maximum(r, 0.0)
        out_ref[...] = r.astype(out_ref.dtype)


def _aggregate(adj_p, z_p, bias_p, *, apply_relu, tm, tk):
    """adj_p: [Np,Np] bf16, z_p: [Np,F] bf16 (F % 128 == 0), bias_p: [1,F] f32."""
    n_pad = adj_p.shape[0]
    f = z_p.shape[1]
    grid = (n_pad // tm, n_pad // tk)
    kernel = functools.partial(_aggregate_kernel, apply_relu=apply_relu)
    return pl.pallas_call(
        kernel,
        out_shape=jax.ShapeDtypeStruct((n_pad, f), jnp.float32),
        grid_spec=pltpu.PrefetchScalarGridSpec(
            num_scalar_prefetch=0,
            grid=grid,
            in_specs=[
                pl.BlockSpec((tm, tk), lambda i, kk: (i, kk)),   # Â tile (streams)
                pl.BlockSpec((tk, f), lambda i, kk: (kk, 0)),    # Z tile
                pl.BlockSpec((1, f), lambda i, kk: (0, 0)),      # bias (resident)
            ],
            out_specs=pl.BlockSpec((tm, f), lambda i, kk: (i, 0)),
            scratch_shapes=[pltpu.VMEM((tm, f), jnp.float32)],
        ),
        compiler_params=pltpu.CompilerParams(
            dimension_semantics=("parallel", "arbitrary"),
            vmem_limit_bytes=32 * 1024 * 1024,
        ),
    )(adj_p, z_p, bias_p)


# ---------------------------------------------------------------------------
# Graph glue + forward pass
# ---------------------------------------------------------------------------
def gcn_normalized_adjacency(edge_index: jnp.ndarray, num_nodes: int) -> jnp.ndarray:
    """Dense D^-1/2 (A + I) D^-1/2 from a [2, E] edge_index (no self loops)."""
    src, dst = edge_index[0], edge_index[1]
    a = jnp.zeros((num_nodes, num_nodes), jnp.float32)
    # scatter-ADD so duplicate edges accumulate (matches message-passing sums)
    a = a.at[dst, src].add(1.0)
    a = a + jnp.eye(num_nodes, dtype=jnp.float32)            # add self loops
    deg = jnp.sum(a, axis=1)
    d_inv_sqrt = jax.lax.rsqrt(jnp.maximum(deg, 1e-12))
    return a * d_inv_sqrt[:, None] * d_inv_sqrt[None, :]


def dgi_encoder_forward(x, edge_index, params):
    n, f_in = x.shape
    w1, b1, w2, b2 = params["w1"], params["b1"], params["w2"], params["b2"]
    hidden, f_out = w1.shape[1], w2.shape[1]

    tm, tk, n_pad = _tiles_for(n)
    h_dim = _round_up(hidden, 128)   # lane-dense hidden
    o_dim = _round_up(f_out, 128)    # lane-dense output

    # Dense normalized adjacency, zero-padded, cast to bf16 for the MXU.
    # TODO(synk): for genuinely sparse graphs (E << N^2) switch to a
    # block-sparse PrefetchScalarGridSpec gather over nonzero Â tiles instead
    # of streaming the dense N×N matrix.
    adj = gcn_normalized_adjacency(edge_index, n)
    adj_p = jnp.zeros((n_pad, n_pad), jnp.bfloat16).at[:n, :n].set(
        adj.astype(jnp.bfloat16))

    # ---- layer 1: h = relu(Â @ (x @ W1) + b1) ----
    w1_p = jnp.zeros((f_in, h_dim), jnp.float32).at[:, :hidden].set(w1)
    b1_p = jnp.zeros((1, h_dim), jnp.float32).at[:, :hidden].set(b1)
    xw = jnp.zeros((n_pad, h_dim), jnp.float32).at[:n].set(x @ w1_p)
    h = _aggregate(adj_p, xw.astype(jnp.bfloat16), b1_p,
                   apply_relu=True, tm=tm, tk=tk)

    # ---- layer 2: out = Â @ (h @ W2) + b2 ----
    w2_p = jnp.zeros((hidden, o_dim), jnp.float32).at[:, :f_out].set(w2)
    b2_p = jnp.zeros((1, o_dim), jnp.float32).at[:, :f_out].set(b2)
    hw = h[:, :hidden] @ w2_p
    out = _aggregate(adj_p, hw.astype(jnp.bfloat16), b2_p,
                     apply_relu=False, tm=tm, tk=tk)

    return out[:n, :f_out]


def init_params(key, in_channels, hidden_channels, out_channels):
    """Glorot-uniform weights + zero biases (PyG GCNConv default init)."""
    k1, k2 = jax.random.split(key)

    def glorot(k, fan_in, fan_out):
        limit = jnp.sqrt(6.0 / (fan_in + fan_out))
        return jax.random.uniform(
            k, (fan_in, fan_out), jnp.float32, minval=-limit, maxval=limit)

    return {
        "w1": glorot(k1, in_channels, hidden_channels),
        "b1": jnp.zeros((1, hidden_channels), jnp.float32),
        "w2": glorot(k2, hidden_channels, out_channels),
        "b2": jnp.zeros((1, out_channels), jnp.float32),
    }


def _reference_forward(x, edge_index, params):
    """Pure f32 JAX reference of the PyG semantics."""
    adj = gcn_normalized_adjacency(edge_index, x.shape[0])
    h = jnp.maximum(adj @ (x @ params["w1"]) + params["b1"], 0.0)
    return adj @ (h @ params["w2"]) + params["b2"]


if __name__ == "__main__":
    key = jax.random.PRNGKey(0)
    k_x, k_p = jax.random.split(key)

    # Small synthetic graph: 16 nodes, 8 input features, hidden=32, out=128.
    num_nodes = 16
    in_channels, hidden_channels, out_channels = 8, 32, 128

    x = jax.random.normal(k_x, (num_nodes, in_channels), jnp.float32)

    # Deterministic undirected ring + one chord (edges in both directions).
    src = jnp.arange(num_nodes)
    dst = (src + 1) % num_nodes
    src_all = jnp.concatenate([src, dst, jnp.array([0, 8])])
    dst_all = jnp.concatenate([dst, src, jnp.array([8, 0])])
    edge_index = jnp.stack([src_all, dst_all]).astype(jnp.int32)  # [2, E]

    params = init_params(k_p, in_channels, hidden_channels, out_channels)

    fwd = jax.jit(dgi_encoder_forward)
    out = jax.block_until_ready(fwd(x, edge_index, params))

    ref = _reference_forward(x, edge_index, params)
    assert out.shape == (num_nodes, out_channels)
    # bf16 operands on the aggregation matmuls -> loosen tolerance vs f32 ref.
    assert jnp.allclose(out, ref, atol=2e-2, rtol=2e-2), (
        float(jnp.max(jnp.abs(out - ref))))

    print("KERNEL_OK")
</pallas_src>

<mosaic_0001>
module attributes {stable_mosaic.version = 11 : i64} {
  func.func @_aggregate_kernel(%arg0: i32, %arg1: i32, %arg2: memref<128x128xbf16, #tpu.memory_space<vmem>>, %arg3: memref<128x128xbf16, #tpu.memory_space<vmem>>, %arg4: memref<1x128xf32, #tpu.memory_space<vmem>>, %arg5: memref<128x128xf32, #tpu.memory_space<vmem>>, %arg6: memref<128x128xf32, #tpu.memory_space<vmem>>) attributes {dimension_semantics = [#tpu.dimension_semantics<parallel>, #tpu.dimension_semantics<arbitrary>], iteration_bounds = array<i64: 1, 1>, scalar_prefetch = 0 : i64, scratch_operands = 1 : i64, tpu.core_type = #tpu.core_type<tc>, window_params = [{transform_indices = @transform_0, window_bounds = array<i64: 128, 128>}, {transform_indices = @transform_1, window_bounds = array<i64: 128, 128>}, {pipeline_mode = #tpu.pipeline_mode<synchronous>, transform_indices = @transform_2, window_bounds = array<i64: 1, 128>}, {transform_indices = @transform_3, window_bounds = array<i64: 128, 128>}]} {
    %c0_i32 = arith.constant 0 : i32
    %0 = arith.cmpi eq, %arg1, %c0_i32 : i32
    %1 = arith.extui %0 : i1 to i32
    %c0_i32_0 = arith.constant 0 : i32
    %2 = arith.cmpi ne, %1, %c0_i32_0 : i32
    scf.if %2 {
      %cst_10 = arith.constant 0.000000e+00 : f32
      %12 = vector.broadcast %cst_10 : f32 to vector<128x128xf32>
      %c0_11 = arith.constant 0 : index
      %c0_12 = arith.constant 0 : index
      %13 = vector.load %arg6[%c0_11, %c0_12] : memref<128x128xf32, #tpu.memory_space<vmem>>, vector<128x128xf32>
      tpu.vector_store %arg6[%c0_11, %c0_12], %12 {strides = array<i32>} : memref<128x128xf32, #tpu.memory_space<vmem>>, vector<128x128xf32>,
    } else {
    }
    %c0 = arith.constant 0 : index
    %c0_1 = arith.constant 0 : index
    %3 = vector.load %arg6[%c0, %c0_1] : memref<128x128xf32, #tpu.memory_space<vmem>>, vector<128x128xf32>
    %c0_2 = arith.constant 0 : index
    %c0_3 = arith.constant 0 : index
    %4 = vector.load %arg2[%c0_2, %c0_3] : memref<128x128xbf16, #tpu.memory_space<vmem>>, vector<128x128xbf16>
    %c0_4 = arith.constant 0 : index
    %c0_5 = arith.constant 0 : index
    %5 = vector.load %arg3[%c0_4, %c0_5] : memref<128x128xbf16, #tpu.memory_space<vmem>>, vector<128x128xbf16>
    %cst = arith.constant dense<0.000000e+00> : vector<128x128xf32>
    %6 = tpu.matmul %4, %5, %cst {dimension_numbers = #tpu.dot_dimension_numbers<[1], [0], [0], [1], [0, 0, 1, 1], [], []>} : vector<128x128xbf16>, vector<128x128xbf16>, vector<128x128xf32> -> vector<128x128xf32>
    %7 = arith.addf %3, %6 : vector<128x128xf32>
    %c0_6 = arith.constant 0 : index
    %c0_7 = arith.constant 0 : index
    %8 = vector.load %arg6[%c0_6, %c0_7] : memref<128x128xf32, #tpu.memory_space<vmem>>, vector<128x128xf32>
    tpu.vector_store %arg6[%c0_6, %c0_7], %7 {strides = array<i32>} : memref<128x128xf32, #tpu.memory_space<vmem>>, vector<128x128xf32>,
    %c0_i32_8 = arith.constant 0 : i32
    %9 = arith.cmpi eq, %arg1, %c0_i32_8 : i32
    %10 = arith.extui %9 : i1 to i32
    %c0_i32_9 = arith.constant 0 : i32
    %11 = arith.cmpi ne, %10, %c0_i32_9 : i32
    scf.if %11 {
      %c0_10 = arith.constant 0 : index
      %c0_11 = arith.constant 0 : index
      %12 = vector.load %arg6[%c0_10, %c0_11] : memref<128x128xf32, #tpu.memory_space<vmem>>, vector<128x128xf32>
      %c0_12 = arith.constant 0 : index
      %c0_13 = arith.constant 0 : index
      %13 = vector.load %arg4[%c0_12, %c0_13] : memref<1x128xf32, #tpu.memory_space<vmem>>, vector<1x128xf32>
      %14 = vector.broadcast %13 : vector<1x128xf32> to vector<128x128xf32>
      %15 = arith.addf %12, %14 : vector<128x128xf32>
      %cst_14 = arith.constant 0.000000e+00 : f32
      %16 = vector.broadcast %cst_14 : f32 to vector<128x128xf32>
      %17 = arith.maximumf %15, %16 : vector<128x128xf32>
      %c0_15 = arith.constant 0 : index
      %c0_16 = arith.constant 0 : index
      %18 = vector.load %arg5[%c0_15, %c0_16] : memref<128x128xf32, #tpu.memory_space<vmem>>, vector<128x128xf32>
      tpu.vector_store %arg5[%c0_15, %c0_16], %17 {strides = array<i32>} : memref<128x128xf32, #tpu.memory_space<vmem>>, vector<128x128xf32>,
    } else {
    }
    return
  }
  func.func @transform_0(%arg0: i32, %arg1: i32) -> (i32, i32) {
    %c0_i32 = arith.constant 0 : i32
    return %arg0, %arg1 : i32, i32
  }
  func.func @transform_1(%arg0: i32, %arg1: i32) -> (i32, i32) {
    %c0_i32 = arith.constant 0 : i32
    %c0_i32_0 = arith.constant 0 : i32
    return %arg1, %c0_i32 : i32, i32
  }
  func.func @transform_2(%arg0: i32, %arg1: i32) -> (i32, i32) {
    %c0_i32 = arith.constant 0 : i32
    %c0_i32_0 = arith.constant 0 : i32
    %c0_i32_1 = arith.constant 0 : i32
    return %c0_i32, %c0_i32_0 : i32, i32
  }
  func.func @transform_3(%arg0: i32, %arg1: i32) -> (i32, i32) {
    %c0_i32 = arith.constant 0 : i32
    %c0_i32_0 = arith.constant 0 : i32
    return %arg0, %c0_i32 : i32, i32
  }
}

module attributes {stable_mosaic.version = 11 : i64} {
  func.func @_aggregate_kernel(%arg0: i32, %arg1: i32, %arg2: memref<128x128xbf16, #tpu.memory_space<vmem>>, %arg3: memref<128x128xbf16, #tpu.memory_space<vmem>>, %arg4: memref<1x128xf32, #tpu.memory_space<vmem>>, %arg5: memref<128x128xf32, #tpu.memory_space<vmem>>, %arg6: memref<128x128xf32, #tpu.memory_space<vmem>>) attributes {dimension_semantics = [#tpu.dimension_semantics<parallel>, #tpu.dimension_semantics<arbitrary>], iteration_bounds = array<i64: 1, 1>, scalar_prefetch = 0 : i64, scratch_operands = 1 : i64, tpu.core_type = #tpu.core_type<tc>, window_params = [{transform_indices = @transform_0, window_bounds = array<i64: 128, 128>}, {transform_indices = @transform_1, window_bounds = array<i64: 128, 128>}, {pipeline_mode = #tpu.pipeline_mode<synchronous>, transform_indices = @transform_2, window_bounds = array<i64: 1, 128>}, {transform_indices = @transform_3, window_bounds = array<i64: 128, 128>}]} {
    %c0_i32 = arith.constant 0 : i32
    %0 = arith.cmpi eq, %arg1, %c0_i32 : i32
    %1 = arith.extui %0 : i1 to i32
    %c0_i32_0 = arith.constant 0 : i32
    %2 = arith.cmpi ne, %1, %c0_i32_0 : i32
    scf.if %2 {
      %cst_10 = arith.constant 0.000000e+00 : f32
      %12 = vector.broadcast %cst_10 : f32 to vector<128x128xf32>
      %c0_11 = arith.constant 0 : index
      %c0_12 = arith.constant 0 : index
      %13 = vector.load %arg6[%c0_11, %c0_12] : memref<128x128xf32, #tpu.memory_space<vmem>>, vector<128x128xf32>
      tpu.vector_store %arg6[%c0_11, %c0_12], %12 {strides = array<i32>} : memref<128x128xf32, #tpu.memory_space<vmem>>, vector<128x128xf32>,
    } else {
    }
    %c0 = arith.constant 0 : index
    %c0_1 = arith.constant 0 : index
    %3 = vector.load %arg6[%c0, %c0_1] : memref<128x128xf32, #tpu.memory_space<vmem>>, vector<128x128xf32>
    %c0_2 = arith.constant 0 : index
    %c0_3 = arith.constant 0 : index
    %4 = vector.load %arg2[%c0_2, %c0_3] : memref<128x128xbf16, #tpu.memory_space<vmem>>, vector<128x128xbf16>
    %c0_4 = arith.constant 0 : index
    %c0_5 = arith.constant 0 : index
    %5 = vector.load %arg3[%c0_4, %c0_5] : memref<128x128xbf16, #tpu.memory_space<vmem>>, vector<128x128xbf16>
    %cst = arith.constant dense<0.000000e+00> : vector<128x128xf32>
    %6 = tpu.matmul %4, %5, %cst {dimension_numbers = #tpu.dot_dimension_numbers<[1], [0], [0], [1], [0, 0, 1, 1], [], []>} : vector<128x128xbf16>, vector<128x128xbf16>, vector<128x128xf32> -> vector<128x128xf32>
    %7 = arith.addf %3, %6 : vector<128x128xf32>
    %c0_6 = arith.constant 0 : index
    %c0_7 = arith.constant 0 : index
    %8 = vector.load %arg6[%c0_6, %c0_7] : memref<128x128xf32, #tpu.memory_space<vmem>>, vector<128x128xf32>
    tpu.vector_store %arg6[%c0_6, %c0_7], %7 {strides = array<i32>} : memref<128x128xf32, #tpu.memory_space<vmem>>, vector<128x128xf32>,
    %c0_i32_8 = arith.constant 0 : i32
    %9 = arith.cmpi eq, %arg1, %c0_i32_8 : i32
    %10 = arith.extui %9 : i1 to i32
    %c0_i32_9 = arith.constant 0 : i32
    %11 = arith.cmpi ne, %10, %c0_i32_9 : i32
    scf.if %11 {
      %c0_10 = arith.constant 0 : index
      %c0_11 = arith.constant 0 : index
      %12 = vector.load %arg6[%c0_10, %c0_11] : memref<128x128xf32, #tpu.memory_space<vmem>>, vector<128x128xf32>
      %c0_12 = arith.constant 0 : index
      %c0_13 = arith.constant 0 : index
      %13 = vector.load %arg4[%c0_12, %c0_13] : memref<1x128xf32, #tpu.memory_space<vmem>>, vector<1x128xf32>
      %14 = vector.broadcast %13 : vector<1x128xf32> to vector<128x128xf32>
      %15 = arith.addf %12, %14 : vector<128x128xf32>
      %c0_14 = arith.constant 0 : index
      %c0_15 = arith.constant 0 : index
      %16 = vector.load %arg5[%c0_14, %c0_15] : memref<128x128xf32, #tpu.memory_space<vmem>>, vector<128x128xf32>
      tpu.vector_store %arg5[%c0_14, %c0_15], %15 {strides = array<i32>} : memref<128x128xf32, #tpu.memory_space<vmem>>, vector<128x128xf32>,
    } else {
    }
    return
  }
  func.func @transform_0(%arg0: i32, %arg1: i32) -> (i32, i32) {
    %c0_i32 = arith.constant 0 : i32
    return %arg0, %arg1 : i32, i32
  }
  func.func @transform_1(%arg0: i32, %arg1: i32) -> (i32, i32) {
    %c0_i32 = arith.constant 0 : i32
    %c0_i32_0 = arith.constant 0 : i32
    return %arg1, %c0_i32 : i32, i32
  }
  func.func @transform_2(%arg0: i32, %arg1: i32) -> (i32, i32) {
    %c0_i32 = arith.constant 0 : i32
    %c0_i32_0 = arith.constant 0 : i32
    %c0_i32_1 = arith.constant 0 : i32
    return %c0_i32, %c0_i32_0 : i32, i32
  }
  func.func @transform_3(%arg0: i32, %arg1: i32) -> (i32, i32) {
    %c0_i32 = arith.constant 0 : i32
    %c0_i32_0 = arith.constant 0 : i32
    return %arg0, %c0_i32 : i32, i32
  }
}

</mosaic_0001>

<bundles_post_ra>
// kernel: dgi_encoder_forward.2
= control target key start
LH: loop header
LB: loop body
LE: loop exit
PB: predicated region body
PF: predicated region fallthrough
CT: control target
= control target key end

     0   :  { %s602_s1 = inlined_call_operand.vmem [shape: bf16[128,128], index: 1, kind: input, shape index: {}]   ;;  %s603_s0 = inlined_call_operand.vmem [shape: bf16[128,128], index: 0, kind: input, shape index: {}]   ;;  %s604_s2 = inlined_call_operand.vmem [shape: f32[1,128], index: 2, kind: input, shape index: {}]   ;;  %s605_s3 = inlined_call_operand.vmem [shape: f32[128,128], index: 3, kind: output, shape index: {}]  }
   0x1   :  { %v467_v0 = vld [vmem:[%s602_s1] sm:$0xff]   ;;  %v468_v1 = vld [vmem:[%s602_s1 + $0x8] sm:$0xff]   ;;  %v469_v2 = vld [vmem:[%s602_s1 + $0x10] sm:$0xff]  }
   0x2   :  { %419 = vmatprep.subr.bf16.mxu0 %v467_v0  ;;  %451 = vmatprep.subr.bf16.mxu1 %v467_v0  ;;  %v470_v3 = vld [vmem:[%s602_s1 + $0x18] sm:$0xff]   ;;  %v475_v4 = vld [vmem:[%s603_s0] sm:$0xff]   ;;  %v472_v7 = vld [vmem:[%s602_s1 + $0x28] sm:$0xff]  }
   0x3   :  { %420 = vmatpush3.bf16.msra.mxu0 %v467_v0  ;;  %459 = vmatpush3.bf16.msra.mxu1 %v467_v0  ;;  %v476_v5 = vld [vmem:[%s603_s0 + $0x20] sm:$0xff]   ;;  %v473_v8 = vld [vmem:[%s602_s1 + $0x30] sm:$0xff]   ;;  %v474_v9 = vld [vmem:[%s602_s1 + $0x38] sm:$0xff]  }
   0x4   :  { %421 = vmatprep.subr.bf16.mxu0 %v468_v1  ;;  %452 = vmatprep.subr.bf16.mxu1 %v468_v1  ;;  %v471_v6 = vld [vmem:[%s602_s1 + $0x20] sm:$0xff]   ;;  %v477_v10 = vld [vmem:[%s603_s0 + $0x8] sm:$0xff]   ;;  %v479_v12 = vld [vmem:[%s603_s0 + $0x10] sm:$0xff]  }
   0x5   :  { %435 = vmatprep.mubr.bf16.mxu0 %v475_v4  ;;  %443 = vmatprep.mubr.bf16.mxu1 %v476_v5  ;;  %v478_v11 = vld [vmem:[%s603_s0 + $0x28] sm:$0xff]   ;;  %v480_v13 = vld [vmem:[%s603_s0 + $0x30] sm:$0xff]   ;;  %v481_v14 = vld [vmem:[%s603_s0 + $0x18] sm:$0xff]  }
   0x6   :  { %v482_v15 = vld [vmem:[%s603_s0 + $0x38] sm:$0xff]   ;;  %v402_v16 = vld [vmem:[%s604_s2] ss:$0 sm:$0xff] }
   0x7   :  { %422 = vmatpush3.bf16.msra.mxu0 %v468_v1  ;;  %460 = vmatpush3.bf16.msra.mxu1 %v468_v1 }
   0x8   :  { %423 = vmatprep.subr.bf16.mxu0 %v469_v2  ;;  %453 = vmatprep.subr.bf16.mxu1 %v469_v2 }
   0xb   :  { %424 = vmatpush3.bf16.msra.mxu0 %v469_v2  ;;  %461 = vmatpush3.bf16.msra.mxu1 %v469_v2 }
   0xc   :  { %425 = vmatprep.subr.bf16.mxu0 %v470_v3  ;;  %454 = vmatprep.subr.bf16.mxu1 %v470_v3 }
   0xf   :  { %426 = vmatpush3.bf16.msra.mxu0 %v470_v3  ;;  %462 = vmatpush3.bf16.msra.mxu1 %v470_v3 }
  0x10   :  { %427 = vmatprep.subr.bf16.mxu0 %v471_v6  ;;  %455 = vmatprep.subr.bf16.mxu1 %v471_v6 }
  0x13   :  { %428 = vmatpush3.bf16.msra.mxu0 %v471_v6  ;;  %463 = vmatpush3.bf16.msra.mxu1 %v471_v6 }
  0x14   :  { %429 = vmatprep.subr.bf16.mxu0 %v472_v7  ;;  %456 = vmatprep.subr.bf16.mxu1 %v472_v7 }
  0x17   :  { %430 = vmatpush3.bf16.msra.mxu0 %v472_v7  ;;  %464 = vmatpush3.bf16.msra.mxu1 %v472_v7 }
  0x18   :  { %431 = vmatprep.subr.bf16.mxu0 %v473_v8  ;;  %457 = vmatprep.subr.bf16.mxu1 %v473_v8 }
  0x1b   :  { %432 = vmatpush3.bf16.msra.mxu0 %v473_v8  ;;  %465 = vmatpush3.bf16.msra.mxu1 %v473_v8 }
  0x1c   :  { %433 = vmatprep.subr.bf16.mxu0 %v474_v9  ;;  %458 = vmatprep.subr.bf16.mxu1 %v474_v9 }
  0x1f   :  { %434 = vmatpush3.bf16.msra.mxu0 %v474_v9  ;;  %466 = vmatpush3.bf16.msra.mxu1 %v474_v9 }
  0x22   :  { %436 = vmatmul.mubr.bf16.vlgmr.msra.gmra.mrb[0].mxu0 %v477_v10  ;;  %444 = vmatmul.mubr.bf16.vlgmr.msra.gmra.mrb[0].mxu1 %v478_v11 }
  0x23   :  { %439 = vmatprep.mubr.bf16.mxu0 %v479_v12  ;;  %447 = vmatprep.mubr.bf16.mxu1 %v480_v13 }
  0x2a   :  { %440 = vmatmul.mubr.bf16.gmra.mrb[4].mxu0 %v481_v14  ;;  %448 = vmatmul.mubr.bf16.gmra.mrb[4].mxu1 %v482_v15 }
  0xf5   :  { %v437_v17 = vpop.f32.mrb[0].mxu0  ;;  %v445_v18 = vpop.f32.mrb[0].mxu1 }
  0xf6   :  { %v336_v19 = vadd.f32 %v437_v17, %v402_v16  ;;  %v344_v20 = vadd.f32 %v445_v18, %v402_v16  ;;  %v213_v21 = vpop.f32.mrb[1].mxu0  ;;  %v245_v22 = vpop.f32.mrb[1].mxu1 }
  0xf7   :  { %v334_v23 = vadd.f32 %v402_v16, %v213_v21  ;;  %v342_v24 = vadd.f32 %v402_v16, %v245_v22  ;;  %v438_v25 = vpop.f32.mrb[2].mxu0  ;;  %v446_v26 = vpop.f32.mrb[2].mxu1 }
  0xf8   :  { %v352_v27 = vmax.f32 %v336_v19, 0.0  ;;  %v360_v28 = vmax.f32 %v344_v20, 0.0  ;;  %v337_v29 = vadd.f32 %v438_v25, %v402_v16  ;;  %v345_v30 = vadd.f32 %v446_v26, %v402_v16  ;;  %v216_v31 = vpop.f32.mrb[3].mxu0  ;;  %v248_v32 = vpop.f32.mrb[3].mxu1 }
  0xf9   :  { %v350_v33 = vmax.f32 %v334_v23, 0.0  ;;  %v358_v34 = vmax.f32 %v342_v24, 0.0  ;;  %v335_v35 = vadd.f32 %v402_v16, %v216_v31  ;;  %v343_v36 = vadd.f32 %v402_v16, %v248_v32 }
  0xfa   :  { %368 = vst [vmem:[%s605_s3 + $0x10] sm:$0xff] %v352_v27  ;;  %376 = vst [vmem:[%s605_s3 + $0x50] sm:$0xff] %v360_v28  ;;  %v353_v37 = vmax.f32 %v337_v29, 0.0  ;;  %v361_v38 = vmax.f32 %v345_v30, 0.0 }
  0xfb   :  { %366 = vst [vmem:[%s605_s3] sm:$0xff] %v350_v33  ;;  %374 = vst [vmem:[%s605_s3 + $0x40] sm:$0xff] %v358_v34  ;;  %v351_v39 = vmax.f32 %v335_v35, 0.0  ;;  %v359_v40 = vmax.f32 %v343_v36, 0.0 }
  0xfc   :  { %369 = vst [vmem:[%s605_s3 + $0x18] sm:$0xff] %v353_v37  ;;  %377 = vst [vmem:[%s605_s3 + $0x58] sm:$0xff] %v361_v38 }
  0xfd   :  { %367 = vst [vmem:[%s605_s3 + $0x8] sm:$0xff] %v351_v39  ;;  %375 = vst [vmem:[%s605_s3 + $0x48] sm:$0xff] %v359_v40  ;;  %v441_v41 = vpop.f32.mrb[4].mxu0  ;;  %v449_v42 = vpop.f32.mrb[4].mxu1 }
  0xfe   :  { %v340_v43 = vadd.f32 %v441_v41, %v402_v16  ;;  %v348_v44 = vadd.f32 %v449_v42, %v402_v16  ;;  %v229_v45 = vpop.f32.mrb[5].mxu0  ;;  %v261_v46 = vpop.f32.mrb[5].mxu1 }
  0xff   :  { %v338_v47 = vadd.f32 %v402_v16, %v229_v45  ;;  %v346_v48 = vadd.f32 %v402_v16, %v261_v46  ;;  %v442_v49 = vpop.f32.mrb[6].mxu0  ;;  %v450_v50 = vpop.f32.mrb[6].mxu1 }
 0x100   :  { %v356_v51 = vmax.f32 %v340_v43, 0.0  ;;  %v364_v52 = vmax.f32 %v348_v44, 0.0  ;;  %v341_v53 = vadd.f32 %v442_v49, %v402_v16  ;;  %v349_v54 = vadd.f32 %v450_v50, %v402_v16  ;;  %v232_v55 = vpop.f32.mrb[7].mxu0  ;;  %v264_v56 = vpop.f32.mrb[7].mxu1 }
 0x101   :  { %v354_v57 = vmax.f32 %v338_v47, 0.0  ;;  %v362_v58 = vmax.f32 %v346_v48, 0.0  ;;  %v339_v59 = vadd.f32 %v402_v16, %v232_v55  ;;  %v347_v60 = vadd.f32 %v402_v16, %v264_v56 }
 0x102   :  { %372 = vst [vmem:[%s605_s3 + $0x30] sm:$0xff] %v356_v51  ;;  %380 = vst [vmem:[%s605_s3 + $0x70] sm:$0xff] %v364_v52  ;;  %v357_v61 = vmax.f32 %v341_v53, 0.0  ;;  %v365_v62 = vmax.f32 %v349_v54, 0.0 }
 0x103   :  { %370 = vst [vmem:[%s605_s3 + $0x20] sm:$0xff] %v354_v57  ;;  %378 = vst [vmem:[%s605_s3 + $0x60] sm:$0xff] %v362_v58  ;;  %v355_v63 = vmax.f32 %v339_v59, 0.0  ;;  %v363_v0 = vmax.f32 %v347_v60, 0.0 }
 0x104   :  { %373 = vst [vmem:[%s605_s3 + $0x38] sm:$0xff] %v357_v61  ;;  %381 = vst [vmem:[%s605_s3 + $0x78] sm:$0xff] %v365_v62 }
 0x105   :  { %371 = vst [vmem:[%s605_s3 + $0x28] sm:$0xff] %v355_v63  ;;  %379 = vst [vmem:[%s605_s3 + $0x68] sm:$0xff] %v363_v0 }

// kernel: dgi_encoder_forward.3
= control target key start
LH: loop header
LB: loop body
LE: loop exit
PB: predicated region body
PF: predicated region fallthrough
CT: control target
= control target key end

     0   :  { %s586_s1 = inlined_call_operand.vmem [shape: bf16[128,128], index: 1, kind: input, shape index: {}]   ;;  %s587_s0 = inlined_call_operand.vmem [shape: bf16[128,128], index: 0, kind: input, shape index: {}]   ;;  %s588_s2 = inlined_call_operand.vmem [shape: f32[1,128], index: 2, kind: input, shape index: {}]   ;;  %s589_s3 = inlined_call_operand.vmem [shape: f32[128,128], index: 3, kind: output, shape index: {}]  }
   0x1   :  { %v451_v0 = vld [vmem:[%s586_s1] sm:$0xff]   ;;  %v452_v1 = vld [vmem:[%s586_s1 + $0x8] sm:$0xff]   ;;  %v453_v2 = vld [vmem:[%s586_s1 + $0x10] sm:$0xff]  }
   0x2   :  { %403 = vmatprep.subr.bf16.mxu0 %v451_v0  ;;  %435 = vmatprep.subr.bf16.mxu1 %v451_v0  ;;  %v454_v3 = vld [vmem:[%s586_s1 + $0x18] sm:$0xff]   ;;  %v459_v4 = vld [vmem:[%s587_s0] sm:$0xff]   ;;  %v456_v7 = vld [vmem:[%s586_s1 + $0x28] sm:$0xff]  }
   0x3   :  { %404 = vmatpush3.bf16.msra.mxu0 %v451_v0  ;;  %443 = vmatpush3.bf16.msra.mxu1 %v451_v0  ;;  %v460_v5 = vld [vmem:[%s587_s0 + $0x20] sm:$0xff]   ;;  %v457_v8 = vld [vmem:[%s586_s1 + $0x30] sm:$0xff]   ;;  %v458_v9 = vld [vmem:[%s586_s1 + $0x38] sm:$0xff]  }
   0x4   :  { %405 = vmatprep.subr.bf16.mxu0 %v452_v1  ;;  %436 = vmatprep.subr.bf16.mxu1 %v452_v1  ;;  %v455_v6 = vld [vmem:[%s586_s1 + $0x20] sm:$0xff]   ;;  %v461_v10 = vld [vmem:[%s587_s0 + $0x8] sm:$0xff]   ;;  %v463_v12 = vld [vmem:[%s587_s0 + $0x10] sm:$0xff]  }
   0x5   :  { %419 = vmatprep.mubr.bf16.mxu0 %v459_v4  ;;  %427 = vmatprep.mubr.bf16.mxu1 %v460_v5  ;;  %v462_v11 = vld [vmem:[%s587_s0 + $0x28] sm:$0xff]   ;;  %v464_v13 = vld [vmem:[%s587_s0 + $0x30] sm:$0xff]   ;;  %v465_v14 = vld [vmem:[%s587_s0 + $0x18] sm:$0xff]  }
   0x6   :  { %v466_v15 = vld [vmem:[%s587_s0 + $0x38] sm:$0xff]   ;;  %v386_v16 = vld [vmem:[%s588_s2] ss:$0 sm:$0xff] }
   0x7   :  { %406 = vmatpush3.bf16.msra.mxu0 %v452_v1  ;;  %444 = vmatpush3.bf16.msra.mxu1 %v452_v1 }
   0x8   :  { %407 = vmatprep.subr.bf16.mxu0 %v453_v2  ;;  %437 = vmatprep.subr.bf16.mxu1 %v453_v2 }
   0xb   :  { %408 = vmatpush3.bf16.msra.mxu0 %v453_v2  ;;  %445 = vmatpush3.bf16.msra.mxu1 %v453_v2 }
   0xc   :  { %409 = vmatprep.subr.bf16.mxu0 %v454_v3  ;;  %438 = vmatprep.subr.bf16.mxu1 %v454_v3 }
   0xf   :  { %410 = vmatpush3.bf16.msra.mxu0 %v454_v3  ;;  %446 = vmatpush3.bf16.msra.mxu1 %v454_v3 }
  0x10   :  { %411 = vmatprep.subr.bf16.mxu0 %v455_v6  ;;  %439 = vmatprep.subr.bf16.mxu1 %v455_v6 }
  0x13   :  { %412 = vmatpush3.bf16.msra.mxu0 %v455_v6  ;;  %447 = vmatpush3.bf16.msra.mxu1 %v455_v6 }
  0x14   :  { %413 = vmatprep.subr.bf16.mxu0 %v456_v7  ;;  %440 = vmatprep.subr.bf16.mxu1 %v456_v7 }
  0x17   :  { %414 = vmatpush3.bf16.msra.mxu0 %v456_v7  ;;  %448 = vmatpush3.bf16.msra.mxu1 %v456_v7 }
  0x18   :  { %415 = vmatprep.subr.bf16.mxu0 %v457_v8  ;;  %441 = vmatprep.subr.bf16.mxu1 %v457_v8 }
  0x1b   :  { %416 = vmatpush3.bf16.msra.mxu0 %v457_v8  ;;  %449 = vmatpush3.bf16.msra.mxu1 %v457_v8 }
  0x1c   :  { %417 = vmatprep.subr.bf16.mxu0 %v458_v9  ;;  %442 = vmatprep.subr.bf16.mxu1 %v458_v9 }
  0x1f   :  { %418 = vmatpush3.bf16.msra.mxu0 %v458_v9  ;;  %450 = vmatpush3.bf16.msra.mxu1 %v458_v9 }
  0x22   :  { %420 = vmatmul.mubr.bf16.vlgmr.msra.gmra.mrb[0].mxu0 %v461_v10  ;;  %428 = vmatmul.mubr.bf16.vlgmr.msra.gmra.mrb[0].mxu1 %v462_v11 }
  0x23   :  { %423 = vmatprep.mubr.bf16.mxu0 %v463_v12  ;;  %431 = vmatprep.mubr.bf16.mxu1 %v464_v13 }
  0x2a   :  { %424 = vmatmul.mubr.bf16.gmra.mrb[4].mxu0 %v465_v14  ;;  %432 = vmatmul.mubr.bf16.gmra.mrb[4].mxu1 %v466_v15 }
  0xf5   :  { %v421_v17 = vpop.f32.mrb[0].mxu0  ;;  %v429_v18 = vpop.f32.mrb[0].mxu1 }
  0xf6   :  { %v336_v19 = vadd.f32 %v421_v17, %v386_v16  ;;  %v344_v20 = vadd.f32 %v429_v18, %v386_v16  ;;  %v213_v21 = vpop.f32.mrb[1].mxu0  ;;  %v245_v22 = vpop.f32.mrb[1].mxu1 }
  0xf7   :  { %v334_v23 = vadd.f32 %v386_v16, %v213_v21  ;;  %v342_v24 = vadd.f32 %v386_v16, %v245_v22  ;;  %v422_v25 = vpop.f32.mrb[2].mxu0  ;;  %v430_v26 = vpop.f32.mrb[2].mxu1 }
  0xf8   :  { %352 = vst [vmem:[%s589_s3 + $0x10] sm:$0xff] %v336_v19  ;;  %360 = vst [vmem:[%s589_s3 + $0x50] sm:$0xff] %v344_v20  ;;  %v337_v27 = vadd.f32 %v422_v25, %v386_v16  ;;  %v345_v28 = vadd.f32 %v430_v26, %v386_v16  ;;  %v216_v29 = vpop.f32.mrb[3].mxu0  ;;  %v248_v30 = vpop.f32.mrb[3].mxu1 }
  0xf9   :  { %350 = vst [vmem:[%s589_s3] sm:$0xff] %v334_v23  ;;  %358 = vst [vmem:[%s589_s3 + $0x40] sm:$0xff] %v342_v24  ;;  %v335_v31 = vadd.f32 %v386_v16, %v216_v29  ;;  %v343_v32 = vadd.f32 %v386_v16, %v248_v30 }
  0xfa   :  { %353 = vst [vmem:[%s589_s3 + $0x18] sm:$0xff] %v337_v27  ;;  %361 = vst [vmem:[%s589_s3 + $0x58] sm:$0xff] %v345_v28 }
  0xfb   :  { %351 = vst [vmem:[%s589_s3 + $0x8] sm:$0xff] %v335_v31  ;;  %359 = vst [vmem:[%s589_s3 + $0x48] sm:$0xff] %v343_v32 }
  0xfd   :  { %v425_v33 = vpop.f32.mrb[4].mxu0  ;;  %v433_v34 = vpop.f32.mrb[4].mxu1 }
  0xfe   :  { %v340_v35 = vadd.f32 %v425_v33, %v386_v16  ;;  %v348_v36 = vadd.f32 %v433_v34, %v386_v16  ;;  %v229_v37 = vpop.f32.mrb[5].mxu0  ;;  %v261_v38 = vpop.f32.mrb[5].mxu1 }
  0xff   :  { %v338_v39 = vadd.f32 %v386_v16, %v229_v37  ;;  %v346_v40 = vadd.f32 %v386_v16, %v261_v38  ;;  %v426_v41 = vpop.f32.mrb[6].mxu0  ;;  %v434_v42 = vpop.f32.mrb[6].mxu1 }
 0x100   :  { %356 = vst [vmem:[%s589_s3 + $0x30] sm:$0xff] %v340_v35  ;;  %364 = vst [vmem:[%s589_s3 + $0x70] sm:$0xff] %v348_v36  ;;  %v341_v43 = vadd.f32 %v426_v41, %v386_v16  ;;  %v349_v44 = vadd.f32 %v434_v42, %v386_v16  ;;  %v232_v45 = vpop.f32.mrb[7].mxu0  ;;  %v264_v46 = vpop.f32.mrb[7].mxu1 }
 0x101   :  { %354 = vst [vmem:[%s589_s3 + $0x20] sm:$0xff] %v338_v39  ;;  %362 = vst [vmem:[%s589_s3 + $0x60] sm:$0xff] %v346_v40  ;;  %v339_v47 = vadd.f32 %v386_v16, %v232_v45  ;;  %v347_v48 = vadd.f32 %v386_v16, %v264_v46 }
 0x102   :  { %357 = vst [vmem:[%s589_s3 + $0x38] sm:$0xff] %v341_v43  ;;  %365 = vst [vmem:[%s589_s3 + $0x78] sm:$0xff] %v349_v44 }
 0x103   :  { %355 = vst [vmem:[%s589_s3 + $0x28] sm:$0xff] %v339_v47  ;;  %363 = vst [vmem:[%s589_s3 + $0x68] sm:$0xff] %v347_v48 }

</bundles_post_ra>
